<compile_context>
chip_gen: v5e
topology: v5e:2x2
jax: 0.10.0
libtpu: 0.0.40
codegen_flags: <defaults>
</compile_context>

<pallas_src>
import functools

import jax
import jax.numpy as jnp
from jax.experimental import pallas as pl
from jax.experimental.pallas import tpu as pltpu


# --------------------------------------------------------------------------
# Device-derived defaults
# --------------------------------------------------------------------------

def _device_kind():
    try:
        return jax.devices()[0].device_kind.lower()
    except Exception:
        return ""


def _vmem_defaults():
    """(tile budget, scoped vmem limit) sized to the device's VMEM capacity."""
    cap = None
    try:
        cap = int(pltpu.get_tpu_info().vmem_capacity_bytes)
    except Exception:
        cap = None
    if cap is not None and cap >= 96 * 1024 * 1024:
        # 128 MiB parts (v5e / v6e): use the headroom for bigger tiles.
        return 48 * 1024 * 1024, 96 * 1024 * 1024
    # 64 MiB parts (v7x) or unknown capacity: stay conservative.
    return 24 * 1024 * 1024, 40 * 1024 * 1024


def _select_compute_dtype(in_dtype, kind):
    # v6e / v7x VPUs are bf16-native: keeping bf16 end-to-end halves vreg
    # traffic and VALU work.  v5e and earlier have no bf16 VPU -> upcast.
    if in_dtype == jnp.bfloat16 and ("v6" in kind or "v7" in kind):
        return jnp.bfloat16
    return jnp.float32


def _choose_row_tile(M, D, vmem_budget_bytes, itemsize):
    """Largest row tile whose double-buffered pipeline fits the VMEM budget."""
    # Two (tm, D) inputs, double-buffered, dominate the pipelined VMEM
    # footprint; the lane-dense (1, tm) mask and the (1, D) accumulator are
    # noise by comparison.
    bytes_per_row = 2 * 2 * D * itemsize
    tm = max(vmem_budget_bytes // bytes_per_row, 1)
    tm = min(tm, 2048)                 # diminishing returns past ~1-2K rows
    if tm >= M:
        return M                       # single tile; full-extent block is legal
    # tm < M: multiple of 128 so the (tm, D) input blocks and the lane-dense
    # (1, tm) mask block satisfy the (8, 128) tiling rule.
    tm = max(128, (tm // 128) * 128)
    # TODO(synk): for extremely large D the forced 128-row minimum can exceed
    # the VMEM budget; such shapes would also need feature-axis tiling (and a
    # D-chunked contraction / accumulate), which this kernel does not implement.
    return tm


# --------------------------------------------------------------------------
# Kernel
# --------------------------------------------------------------------------

def _masked_mse_kernel(p_ref, t_ref, m_ref, out_ref, *,
                       M, tm, n_inner, compute_dtype):
    """One grid step: out_ref += mask_row @ (p - t)^2 for this row tile.

    Grid is (nc, n_inner): axis 0 is the per-core chunk axis, axis 1 walks the
    row tiles of the chunk ("arbitrary" reduction).  out_ref is a per-chunk
    (1, D) f32 accumulator resident in VMEM.
    """
    c = pl.program_id(0)
    i = pl.program_id(1)

    @pl.when(i == 0)
    def _():
        out_ref[...] = jnp.zeros_like(out_ref)

    # Number of valid rows in this tile.  Phantom tiles (clamped block index
    # when the tile count does not split evenly across chunks) get
    # n_valid <= 0 and contribute exactly zero.
    n_valid = M - (c * n_inner + i) * tm

    p = p_ref[...].astype(compute_dtype)
    t = t_ref[...].astype(compute_dtype)
    diff = p - t
    sq = diff * diff                                           # (tm, D)
    m = m_ref[...].astype(compute_dtype)                       # (1, tm)

    # Hot path: full tiles need no neutralisation at all -> just the MXU
    # contraction over this tile's rows: (1, tm) @ (tm, D) -> (1, D).
    @pl.when(n_valid >= tm)
    def _():
        out_ref[...] += jnp.dot(m, sq, preferred_element_type=jnp.float32)

    # Cold path (at most one partial tile per chunk): select-out out-of-range
    # rows and mask lanes so stale inf/NaN in the tail region cannot reach the
    # MXU (0 * NaN under a plain multiply would still be NaN).
    @pl.when(n_valid < tm)
    def _():
        row_ids = jax.lax.broadcasted_iota(jnp.int32, (tm, 1), 0)
        lane_ids = jax.lax.broadcasted_iota(jnp.int32, (1, tm), 1)
        sq_t = jnp.where(row_ids < n_valid, sq, 0).astype(compute_dtype)
        m_t = jnp.where(lane_ids < n_valid, m, 0).astype(compute_dtype)
        out_ref[...] += jnp.dot(m_t, sq_t, preferred_element_type=jnp.float32)


# --------------------------------------------------------------------------
# Wrapper
# --------------------------------------------------------------------------

def _masked_mse_fallback(preds, target, mask):
    # Lane-sparse D: XLA's fused reduction beats a Pallas kernel here.
    loss = ((preds.astype(jnp.float32) - target.astype(jnp.float32)) ** 2).mean(axis=-1)
    m = mask.astype(jnp.float32).reshape(loss.shape)
    return (loss * m).sum() / m.sum()


def masked_mse_loss(preds, target, mask, *,
                    vmem_budget_bytes=None,
                    vmem_limit_bytes=None,
                    num_core_chunks=None):
    """preds/target: (..., D); mask: (...) with identical leading dims."""
    assert preds.shape == target.shape
    D = preds.shape[-1]

    if D < 128:
        return _masked_mse_fallback(preds, target, mask)

    kind = _device_kind()
    budget_default, limit_default = _vmem_defaults()
    if vmem_budget_bytes is None:
        vmem_budget_bytes = budget_default
    if vmem_limit_bytes is None:
        vmem_limit_bytes = limit_default

    p2 = preds.reshape(-1, D)
    t2 = target.reshape(-1, D)
    M = p2.shape[0]
    m_row = mask.reshape(1, -1).astype(jnp.float32)            # (1, M) lane-dense
    assert m_row.shape[1] == M

    itemsize = jnp.dtype(preds.dtype).itemsize
    compute_dtype = _select_compute_dtype(jnp.dtype(preds.dtype), kind)

    tm = _choose_row_tile(M, D, vmem_budget_bytes, itemsize)
    n_blk = (M + tm - 1) // tm                                  # row tiles total

    # Core-chunk axis: 2 only where there genuinely are 2 TensorCores (v7x);
    # on single-TC parts a second chunk just adds phantom-tile waste.
    if num_core_chunks is None:
        nc = 2 if "v7" in kind else 1
    else:
        nc = int(num_core_chunks)
    nc = max(1, min(nc, n_blk))
    n_inner = (n_blk + nc - 1) // nc                            # tiles per chunk

    if nc > 1 and "v7" in kind:
        axis0 = getattr(pltpu, "CORE_PARALLEL", "parallel")     # shard across TCs
    elif nc > 1:
        axis0 = "parallel"
    else:
        axis0 = "arbitrary"

    def data_map(c, i):
        return (jnp.minimum(c * n_inner + i, n_blk - 1), 0)

    def mask_map(c, i):
        return (0, jnp.minimum(c * n_inner + i, n_blk - 1))

    kernel = functools.partial(_masked_mse_kernel, M=M, tm=tm, n_inner=n_inner,
                               compute_dtype=compute_dtype)

    cost = pl.CostEstimate(
        flops=3 * M * D,
        transcendentals=0,
        bytes_accessed=2 * M * D * itemsize + 4 * M + 4 * nc * D,
    )

    partials = pl.pallas_call(
        kernel,
        out_shape=jax.ShapeDtypeStruct((nc, D), jnp.float32),
        grid_spec=pltpu.PrefetchScalarGridSpec(
            num_scalar_prefetch=0,
            grid=(nc, n_inner),
            in_specs=[
                pl.BlockSpec((tm, D), data_map),
                pl.BlockSpec((tm, D), data_map),
                pl.BlockSpec((1, tm), mask_map),
            ],
            out_specs=pl.BlockSpec((1, D), lambda c, i: (c, 0)),
        ),
        compiler_params=pltpu.CompilerParams(
            dimension_semantics=(axis0, "arbitrary"),
            vmem_limit_bytes=vmem_limit_bytes,
        ),
        cost_estimate=cost,
    )(p2, t2, m_row)

    num = jnp.sum(partials)            # tiny: nc * D elements
    den = jnp.sum(m_row)               # tiny: M elements (wrapper-side denominator)
    # Matches the reference ordering: per-row mean over D, masked mean over rows.
    # (mask.sum() == 0 yields nan/inf, same as the PyTorch reference.)
    return num / jnp.float32(D) / den


def masked_mse_loss_ref(preds, target, mask):
    loss = (preds - target) ** 2
    loss = loss.mean(axis=-1)
    return (loss * mask).sum() / mask.sum()


if __name__ == "__main__":
    key = jax.random.PRNGKey(0)
    k1, k2, k3 = jax.random.split(key, 3)

    # Main test: exercises the Pallas kernel path (D >= 128).
    B, S, D = 2, 8, 128
    preds = jax.random.normal(k1, (B, S, D), dtype=jnp.float32)
    target = jax.random.normal(k2, (B, S, D), dtype=jnp.float32)
    mask = (jax.random.uniform(k3, (B, S)) > 0.3).astype(jnp.float32)

    out = jax.block_until_ready(masked_mse_loss(preds, target, mask))
    ref = masked_mse_loss_ref(preds, target, mask)
    assert jnp.allclose(out, ref, rtol=1e-5, atol=1e-5), (out, ref)

    # bf16 inputs: kernel keeps bf16 compute on bf16-native parts (v6e/v7x).
    preds_bf = preds.astype(jnp.bfloat16)
    target_bf = target.astype(jnp.bfloat16)
    out_bf = jax.block_until_ready(masked_mse_loss(preds_bf, target_bf, mask))
    ref_bf = masked_mse_loss_ref(preds_bf.astype(jnp.float32),
                                 target_bf.astype(jnp.float32), mask)
    assert jnp.allclose(out_bf, ref_bf, rtol=3e-2, atol=3e-2), (out_bf, ref_bf)

    # Small-D fallback path (D < 128 -> fused jnp reduction, not the kernel).
    Ds = 32
    preds_s = jax.random.normal(k1, (B, S, Ds), dtype=jnp.float32)
    target_s = jax.random.normal(k2, (B, S, Ds), dtype=jnp.float32)
    out_s = jax.block_until_ready(masked_mse_loss(preds_s, target_s, mask))
    ref_s = masked_mse_loss_ref(preds_s, target_s, mask)
    assert jnp.allclose(out_s, ref_s, rtol=1e-5, atol=1e-5), (out_s, ref_s)

    print("KERNEL_OK")
</pallas_src>

<mosaic_0001>
module attributes {stable_mosaic.version = 11 : i64} {
  func.func @_masked_mse_kernel(%arg0: i32, %arg1: i32, %arg2: memref<16x128xf32, #tpu.memory_space<vmem>>, %arg3: memref<16x128xf32, #tpu.memory_space<vmem>>, %arg4: memref<1x16xf32, #tpu.memory_space<vmem>>, %arg5: memref<1x128xf32, #tpu.memory_space<vmem>>) attributes {dimension_semantics = [#tpu.dimension_semantics<arbitrary>, #tpu.dimension_semantics<arbitrary>], iteration_bounds = array<i64: 1, 1>, scalar_prefetch = 0 : i64, scratch_operands = 0 : i64, tpu.core_type = #tpu.core_type<tc>, window_params = [{transform_indices = @transform_0, window_bounds = array<i64: 16, 128>}, {transform_indices = @transform_1, window_bounds = array<i64: 16, 128>}, {transform_indices = @transform_2, window_bounds = array<i64: 1, 16>}, {transform_indices = @transform_3, window_bounds = array<i64: 1, 128>}]} {
    %c0_i32 = arith.constant 0 : i32
    %0 = arith.cmpi eq, %arg1, %c0_i32 : i32
    %1 = arith.extui %0 : i1 to i32
    %c0_i32_0 = arith.constant 0 : i32
    %2 = arith.cmpi ne, %1, %c0_i32_0 : i32
    scf.if %2 {
      %cst = arith.constant 0.000000e+00 : f32
      %18 = vector.broadcast %cst : f32 to vector<1x128xf32>
      %c0_11 = arith.constant 0 : index
      %c0_12 = arith.constant 0 : index
      %19 = vector.load %arg5[%c0_11, %c0_12] : memref<1x128xf32, #tpu.memory_space<vmem>>, vector<1x128xf32>
      tpu.vector_store %arg5[%c0_11, %c0_12], %18 {strides = array<i32>} : memref<1x128xf32, #tpu.memory_space<vmem>>, vector<1x128xf32>,
    } else {
    }
    %c1_i32 = arith.constant 1 : i32
    %3 = arith.muli %arg0, %c1_i32 : i32
    %4 = arith.addi %3, %arg1 : i32
    %c16_i32 = arith.constant 16 : i32
    %5 = arith.muli %4, %c16_i32 : i32
    %c16_i32_1 = arith.constant 16 : i32
    %6 = arith.subi %c16_i32_1, %5 : i32
    %c0 = arith.constant 0 : index
    %c0_2 = arith.constant 0 : index
    %7 = vector.load %arg2[%c0, %c0_2] : memref<16x128xf32, #tpu.memory_space<vmem>>, vector<16x128xf32>
    %c0_3 = arith.constant 0 : index
    %c0_4 = arith.constant 0 : index
    %8 = vector.load %arg3[%c0_3, %c0_4] : memref<16x128xf32, #tpu.memory_space<vmem>>, vector<16x128xf32>
    %9 = arith.subf %7, %8 : vector<16x128xf32>
    %10 = arith.mulf %9, %9 : vector<16x128xf32>
    %c0_5 = arith.constant 0 : index
    %c0_6 = arith.constant 0 : index
    %11 = vector.load %arg4[%c0_5, %c0_6] : memref<1x16xf32, #tpu.memory_space<vmem>>, vector<1x16xf32>
    %c16_i32_7 = arith.constant 16 : i32
    %12 = arith.cmpi sge, %6, %c16_i32_7 : i32
    %13 = arith.extui %12 : i1 to i32
    %c0_i32_8 = arith.constant 0 : i32
    %14 = arith.cmpi ne, %13, %c0_i32_8 : i32
    scf.if %14 {
      %c0_11 = arith.constant 0 : index
      %c0_12 = arith.constant 0 : index
      %18 = vector.load %arg5[%c0_11, %c0_12] : memref<1x128xf32, #tpu.memory_space<vmem>>, vector<1x128xf32>
      %cst = arith.constant dense<0.000000e+00> : vector<1x128xf32>
      %19 = tpu.matmul %11, %10, %cst {dimension_numbers = #tpu.dot_dimension_numbers<[1], [0], [0], [1], [0, 0, 1, 1], [], []>} : vector<1x16xf32>, vector<16x128xf32>, vector<1x128xf32> -> vector<1x128xf32>
      %20 = arith.addf %18, %19 : vector<1x128xf32>
      %c0_13 = arith.constant 0 : index
      %c0_14 = arith.constant 0 : index
      %21 = vector.load %arg5[%c0_13, %c0_14] : memref<1x128xf32, #tpu.memory_space<vmem>>, vector<1x128xf32>
      tpu.vector_store %arg5[%c0_13, %c0_14], %20 {strides = array<i32>} : memref<1x128xf32, #tpu.memory_space<vmem>>, vector<1x128xf32>,
    } else {
    }
    %c16_i32_9 = arith.constant 16 : i32
    %15 = arith.cmpi slt, %6, %c16_i32_9 : i32
    %16 = arith.extui %15 : i1 to i32
    %c0_i32_10 = arith.constant 0 : i32
    %17 = arith.cmpi ne, %16, %c0_i32_10 : i32
    scf.if %17 {
      %18 = tpu.iota {dimensions = array<i32: 0>} : vector<16x1xi32>
      %19 = tpu.iota {dimensions = array<i32: 1>} : vector<1x16xi32>
      %20 = vector.broadcast %6 : i32 to vector<16x1xi32>
      %21 = arith.cmpi slt, %18, %20 : vector<16x1xi32>
      %c0_i32_11 = arith.constant 0 : i32
      %22 = arith.sitofp %c0_i32_11 : i32 to f32
      %23 = vector.shape_cast %21 : vector<16x1xi1> to vector<16x1xi1>
      %24 = vector.broadcast %23 : vector<16x1xi1> to vector<16x128xi1>
      %25 = vector.broadcast %22 : f32 to vector<16x128xf32>
      %26 = arith.select %24, %10, %25 : vector<16x128xi1>, vector<16x128xf32>
      %27 = vector.broadcast %6 : i32 to vector<1x16xi32>
      %28 = arith.cmpi slt, %19, %27 : vector<1x16xi32>
      %c0_i32_12 = arith.constant 0 : i32
      %29 = arith.sitofp %c0_i32_12 : i32 to f32
      %30 = vector.broadcast %29 : f32 to vector<1x16xf32>
      %31 = arith.select %28, %11, %30 : vector<1x16xi1>, vector<1x16xf32>
      %c0_13 = arith.constant 0 : index
      %c0_14 = arith.constant 0 : index
      %32 = vector.load %arg5[%c0_13, %c0_14] : memref<1x128xf32, #tpu.memory_space<vmem>>, vector<1x128xf32>
      %cst = arith.constant dense<0.000000e+00> : vector<1x128xf32>
      %33 = tpu.matmul %31, %26, %cst {dimension_numbers = #tpu.dot_dimension_numbers<[1], [0], [0], [1], [0, 0, 1, 1], [], []>} : vector<1x16xf32>, vector<16x128xf32>, vector<1x128xf32> -> vector<1x128xf32>
      %34 = arith.addf %32, %33 : vector<1x128xf32>
      %c0_15 = arith.constant 0 : index
      %c0_16 = arith.constant 0 : index
      %35 = vector.load %arg5[%c0_15, %c0_16] : memref<1x128xf32, #tpu.memory_space<vmem>>, vector<1x128xf32>
      tpu.vector_store %arg5[%c0_15, %c0_16], %34 {strides = array<i32>} : memref<1x128xf32, #tpu.memory_space<vmem>>, vector<1x128xf32>,
    } else {
    }
    return
  }
  func.func @transform_0(%arg0: i32, %arg1: i32) -> (i32, i32) {
    %c1_i32 = arith.constant 1 : i32
    %0 = arith.muli %arg0, %c1_i32 : i32
    %1 = arith.addi %0, %arg1 : i32
    %c0_i32 = arith.constant 0 : i32
    %2 = arith.minsi %1, %c0_i32 : i32
    %c0_i32_0 = arith.constant 0 : i32
    %c0_i32_1 = arith.constant 0 : i32
    return %2, %c0_i32_0 : i32, i32
  }
  func.func @transform_1(%arg0: i32, %arg1: i32) -> (i32, i32) {
    %c1_i32 = arith.constant 1 : i32
    %0 = arith.muli %arg0, %c1_i32 : i32
    %1 = arith.addi %0, %arg1 : i32
    %c0_i32 = arith.constant 0 : i32
    %2 = arith.minsi %1, %c0_i32 : i32
    %c0_i32_0 = arith.constant 0 : i32
    %c0_i32_1 = arith.constant 0 : i32
    return %2, %c0_i32_0 : i32, i32
  }
  func.func @transform_2(%arg0: i32, %arg1: i32) -> (i32, i32) {
    %c1_i32 = arith.constant 1 : i32
    %0 = arith.muli %arg0, %c1_i32 : i32
    %1 = arith.addi %0, %arg1 : i32
    %c0_i32 = arith.constant 0 : i32
    %2 = arith.minsi %1, %c0_i32 : i32
    %c0_i32_0 = arith.constant 0 : i32
    %c0_i32_1 = arith.constant 0 : i32
    return %c0_i32_0, %2 : i32, i32
  }
  func.func @transform_3(%arg0: i32, %arg1: i32) -> (i32, i32) {
    %c0_i32 = arith.constant 0 : i32
    %c0_i32_0 = arith.constant 0 : i32
    return %arg0, %c0_i32 : i32, i32
  }
}

</mosaic_0001>

<bundles_post_ra>
// kernel: tpu_custom_call.1
= control target key start
LH: loop header
LB: loop body
LE: loop exit
PB: predicated region body
PF: predicated region fallthrough
CT: control target
= control target key end

     0   :  { %8 = vsyncpa [#allocation3], 0  ;;  %s335_s0 = inlined_call_operand.hbm [shape: f32[16,128], index: 0, kind: input, shape index: {}]   ;;  %s336_s1 = inlined_call_operand.hbm [shape: f32[16,128], index: 1, kind: input, shape index: {}]   ;;  %s337_s2 = inlined_call_operand.vmem [shape: f32[1,16], index: 2, kind: input, shape index: {}]   ;;  %s338_s3 = inlined_call_operand.hbm [shape: f32[1,128], index: 3, kind: output, shape index: {}]  }
   0x1   :  { %9 = vsyncpa [#allocation6], 0 }
   0x2   :  { %10 = vsyncpa [#allocation4], 0  ;;  %s21_s14 = sshll.u32 %s335_s0, 4  ;;  %s297_s15 = smov [#allocation2]   ;;  %s22_s14 = int_to_ptr.hbm [resolvable:$true] %s21_s14 }
   0x3   :  { %s23_s16 = sshll.u32 %s297_s15, 4  ;;  %s40_s19 = sshll.u32 %s336_s1, 4  ;;  %s24_s16 = int_to_ptr.vmem [resolvable:$true] %s23_s16  ;;  %s41_s19 = int_to_ptr.hbm [resolvable:$true] %s40_s19 }
   0x4   :  { %s298_s20 = smov 128   ;;  %s299_s21 = smov 8  }
   0x5   :  { %29 = dma.hbm_to_vmem [thread:$0]  %s22_s14, 256, %s24_s16, [#allocation3], %s298_s20, %s298_s20, %s299_s21  }
   0x6   :  { %s300_s22 = smov [#allocation5]  }
   0x7   :  { %s42_s23 = sshll.u32 %s300_s22, 4  ;;  %s43_s23 = int_to_ptr.vmem [resolvable:$true] %s42_s23 }
   0x8   :  { %48 = dma.hbm_to_vmem [thread:$0]  %s41_s19, 256, %s43_s23, [#allocation6], %s298_s20, %s298_s20, %s299_s21  }
   0x9   :  { %291 = dma.done.wait [#allocation3], 256  }
   0xa   :  { %292 = vsyncadd [#allocation3], 4294967040 }
   0xb   :  { %293 = dma.done.wait [#allocation6], 256  }
   0xc   :  { %294 = vsyncadd [#allocation6], 4294967040  ;;  %v301_v0 = vmov 0.0   ;;  %v100_v1 = vld [vmem:[#allocation2 + $0x8] sm:$0xff]  ;;  %v102_v2 = vld [vmem:[#allocation5 + $0x8] sm:$0xff]  ;;  %vm113_vm0 = vcmask 130048  }
   0xd   :  { %95 = vst [vmem:[#allocation7] sm:$0x1] %v301_v0  ;;  %v99_v3 = vld [vmem:[#allocation2] sm:$0xff]  ;;  %v104_v4 = vsub.f32 %v100_v1, %v102_v2  ;;  %v101_v5 = vld [vmem:[#allocation5] sm:$0xff]  ;;  %s302_s24 = smov [#allocation7]   ;;  %s193_s28 = sshll.u32 %s338_s3, 4  ;;  %s194_s28 = int_to_ptr.hbm [resolvable:$true] %s193_s28 }
   0xe   :  { %v103_v6 = vsub.f32 %v99_v3, %v101_v5  ;;  %v107_v9 = vld [vmem:[%s337_s2] sm:$0x1]  ;;  %s191_s25 = sshll.u32 %s302_s24, 4  ;;  %s192_s25 = int_to_ptr.vmem [resolvable:$true] %s191_s25 }
   0xf   :  { %v106_v7 = vmul.f32 %v104_v4, %v104_v4 }
  0x10   :  { %v105_v8 = vmul.f32 %v103_v6, %v103_v6 }
  0x11   :  { %131 = vmatpush.msra.mxu0 %v106_v7 }
  0x13   :  { %132 = vmatpush.msra.mxu0 %v105_v8 }
  0x14   :  { %211 = vmatmul.msk.f32.vlgmr.msra.gmra.mxu0 %vm113_vm0, %v107_v9  ;;  %v112_v10 = vld [vmem:[#allocation7] sm:$0x1] }
  0x91   :  { %v134_v11 = vpop.f32.mrf.mxu0 }
  0x92   :  { %v137_v12 = vadd.f32 %v134_v11, %v112_v10 }
  0x94   :  { %138 = vst [vmem:[#allocation7] sm:$0x1] %v137_v12 }
  0x95   :  { %196 = dma.vmem_to_hbm [thread:$0]  %s192_s25, 16, %s194_s28, [#allocation4]  }
  0x96   :  { %295 = dma.done.wait [#allocation4], 16  }
  0x97   :  { %296 = vsyncadd [#allocation4], 4294967280 }
  0x98   :  { %201 = vsyncpa [#allocation3], 1 }
  0x99   :  { %202 = vsyncpa [#allocation6], 1 }
  0x9a   :  { %203 = vsyncpa [#allocation4], 1 }

</bundles_post_ra>
